<compile_context>
chip_gen: v7x
topology: tpu7x:2x2x1
jax: 0.10.0
libtpu: 0.0.40
codegen_flags: <defaults>
</compile_context>

<pallas_src>
import functools

import jax
import jax.numpy as jnp
from jax import lax
from jax.experimental import pallas as pl
from jax.experimental.pallas import tpu as pltpu


def _round_up(x: int, m: int) -> int:
    return (x + m - 1) // m * m


def _device_tile_defaults():
    """(tm, tn, tk, vmem_limit_bytes) per TPU generation (roofline-driven)."""
    try:
        kind = jax.devices()[0].device_kind.lower()
    except Exception:  # pragma: no cover - defensive
        kind = ""
    if "v5" in kind:
        # v5e knee ~240 FLOP/B -> already near compute-bound at modest tiles.
        return 1024, 512, 512, 32 * 1024 * 1024
    if "v6" in kind:
        # v6e needs ~650 FLOP/B -> large output-reuse tiles + raised scoped VMEM.
        return 2048, 1024, 512, 64 * 1024 * 1024
    if "v7" in kind:
        # v7x needs ~310 FLOP/B; 1024x1024 gives ~512 FLOP/B in ~16 MiB VMEM.
        # Do NOT carry the v6e 2048-tile config over (only 64 MiB physical VMEM).
        return 1024, 1024, 512, None
    return 1024, 512, 512, None  # conservative fallback


def _linear_kernel(x_ref, w_ref, b_ref, o_ref, acc_ref):
    """One (tm, tn) logits tile; grid axis 2 iterates over K tiles.

    x_ref:   (tm, tk)  activations (compute dtype)
    w_ref:   (tn, tk)  PyTorch-layout weight tile (compute dtype)
    b_ref:   (1,  tn)  bias tile (f32)
    o_ref:   (tm, tn)  output tile
    acc_ref: (tm, tn)  f32 accumulator scratch
    """
    k = pl.program_id(2)

    @pl.when(k == 0)
    def _():
        # Fold the bias into the accumulator init: no separate epilogue add.
        acc_ref[...] = jnp.broadcast_to(b_ref[...], acc_ref.shape)

    # x @ W^T without materializing a transpose: contract dim 1 with dim 1.
    acc_ref[...] += lax.dot_general(
        x_ref[...],
        w_ref[...],
        dimension_numbers=(((1,), (1,)), ((), ())),
        preferred_element_type=jnp.float32,
    )

    @pl.when(k == pl.num_programs(2) - 1)
    def _():
        o_ref[...] = acc_ref[...].astype(o_ref.dtype)


def prepare_bert_head_params(weight, bias, *, tn=None, tk=None,
                             compute_dtype=jnp.bfloat16):
    """One-time parameter prep (cast + zero-pad). Call at load time, not per step.

    weight: [N, D] (PyTorch nn.Linear layout), bias: [N]
    Returns (w_prepped [N_pad, D_pad] compute_dtype, b_prepped [1, N_pad] f32).
    """
    N, D = weight.shape
    _, dtn, dtk, _ = _device_tile_defaults()
    tn = dtn if tn is None else tn
    tk = dtk if tk is None else tk

    tn_eff = tn if tn < N else N
    tk_eff = tk if tk < D else D
    if tn_eff < N:
        assert tn_eff % 128 == 0, "tn must be a multiple of 128 when tiling N"
    if tk_eff < D:
        assert tk_eff % 128 == 0, "tk must be a multiple of 128 when tiling K"

    N_pad = _round_up(N, tn_eff)
    D_pad = _round_up(D, tk_eff)

    w = weight.astype(compute_dtype)
    if (N_pad, D_pad) != (N, D):
        w = jnp.pad(w, ((0, N_pad - N), (0, D_pad - D)))
    b = bias.astype(jnp.float32).reshape(1, N)
    if N_pad != N:
        b = jnp.pad(b, ((0, 0), (0, N_pad - N)))
    return w, b


@functools.partial(
    jax.jit, static_argnames=("n_vocab", "tm", "tn", "tk", "out_dtype")
)
def bert_head_forward(x, w_prepped, b_prepped, *, n_vocab,
                      tm=None, tn=None, tk=None, out_dtype=None):
    """logits = x @ weight.T + bias (matches nn.Linear forward).

    x:         [B, S, D]
    w_prepped: [N_pad, D_pad] pre-cast / pre-padded weight (from prepare_*).
    b_prepped: [1, N_pad] f32 pre-padded bias.
    n_vocab:   original N (padded vocab columns are stripped if any).
    Returns [B, S, n_vocab] in `out_dtype` (default: x.dtype; pass jnp.bfloat16
    to halve the logits writeback stream).
    """
    B, S, D = x.shape
    N_pad, D_pad = w_prepped.shape
    assert D_pad >= D and N_pad >= n_vocab
    M = B * S
    compute_dtype = w_prepped.dtype
    out_dtype = out_dtype or x.dtype

    # --- tile selection -----------------------------------------------------
    dtm, dtn, dtk, vmem_limit = _device_tile_defaults()
    tn = dtn if tn is None else tn
    tk = dtk if tk is None else tk

    # bf16 packs 2 rows per sublane -> 16-row alignment for M tiles.
    row_align = 16 if jnp.dtype(compute_dtype).itemsize == 2 else 8

    if tm is None:
        # Cover all of M when it fits: grid M-axis == 1, so the [N, D] weight
        # streams from HBM exactly once per forward.
        tm = _round_up(M, row_align) if M <= 2048 else dtm

    tm_eff = tm if tm < M else _round_up(M, row_align)
    tn_eff = tn if tn < N_pad else N_pad
    tk_eff = tk if tk < D_pad else D_pad
    if tm_eff < M:
        assert tm_eff % row_align == 0, (
            f"tm must be a multiple of {row_align} when tiling M")
    if tn_eff < N_pad:
        assert tn_eff % 128 == 0 and N_pad % tn_eff == 0
    if tk_eff < D_pad:
        assert tk_eff % 128 == 0 and D_pad % tk_eff == 0

    M_pad = _round_up(M, tm_eff)
    grid_m = M_pad // tm_eff
    grid_n = N_pad // tn_eff
    grid_k = D_pad // tk_eff
    # Note (v7x): with grid_m == 1 the N axis carries the 2-TensorCore split;
    # for a real LM head grid_n >> 2 so both cores stay busy.

    # --- activations: flatten, cast, zero-pad only when strictly needed ------
    x2d = x.reshape(M, D).astype(compute_dtype)
    if (M_pad, D_pad) != (M, D):
        x2d = jnp.pad(x2d, ((0, M_pad - M), (0, D_pad - D)))

    x_item = jnp.dtype(compute_dtype).itemsize
    cost = pl.CostEstimate(
        flops=2 * M_pad * N_pad * D_pad,
        transcendentals=0,
        bytes_accessed=(
            M_pad * D_pad * x_item * grid_n          # x re-streamed per N tile
            + N_pad * D_pad * x_item * grid_m        # weight re-streamed per M tile
            + N_pad * 4                              # bias
            + M_pad * N_pad * jnp.dtype(out_dtype).itemsize  # logits writeback
        ),
    )

    cp_kwargs = dict(dimension_semantics=("parallel", "parallel", "arbitrary"))
    if vmem_limit is not None:
        cp_kwargs["vmem_limit_bytes"] = vmem_limit

    out2d = pl.pallas_call(
        _linear_kernel,
        out_shape=jax.ShapeDtypeStruct((M_pad, N_pad), out_dtype),
        grid_spec=pltpu.PrefetchScalarGridSpec(
            num_scalar_prefetch=0,
            grid=(grid_m, grid_n, grid_k),
            in_specs=[
                pl.BlockSpec((tm_eff, tk_eff), lambda i, j, k: (i, k)),  # x
                pl.BlockSpec((tn_eff, tk_eff), lambda i, j, k: (j, k)),  # W [N,D]
                pl.BlockSpec((1, tn_eff), lambda i, j, k: (0, j)),       # bias
            ],
            out_specs=pl.BlockSpec((tm_eff, tn_eff), lambda i, j, k: (i, j)),
            scratch_shapes=[pltpu.VMEM((tm_eff, tn_eff), jnp.float32)],
        ),
        compiler_params=pltpu.CompilerParams(**cp_kwargs),
        cost_estimate=cost,
    )(x2d, w_prepped, b_prepped)

    if (M_pad, N_pad) != (M, n_vocab):
        # TODO(synk): for a production LM head, pad the vocab at the model level
        # (mask padded columns in the loss) and keep padded logits to avoid this
        # full-logits slice copy; it only triggers for non-divisible shapes here.
        out2d = out2d[:M, :n_vocab]
    return out2d.reshape(B, S, n_vocab)


if __name__ == "__main__":
    # ---- Test 1: aligned shapes, bf16 compute, prepared params (fast path) --
    B, S, D, N_VOCAB = 2, 8, 128, 256

    key = jax.random.PRNGKey(0)
    kx, kw, kb = jax.random.split(key, 3)

    x = jax.random.normal(kx, (B, S, D), dtype=jnp.float32)
    # nn.Linear(model_dim, n_vocab): weight [n_vocab, model_dim], bias [n_vocab]
    bound = 1.0 / (D ** 0.5)
    weight = jax.random.uniform(kw, (N_VOCAB, D), jnp.float32, -bound, bound)
    bias = jax.random.uniform(kb, (N_VOCAB,), jnp.float32, -bound, bound)

    # Parameter prep happens ONCE (offline); the forward never touches raw params.
    w_p, b_p = prepare_bert_head_params(weight, bias)
    logits = bert_head_forward(x, w_p, b_p, n_vocab=N_VOCAB)
    jax.block_until_ready(logits)

    ref = x @ weight.T + bias
    assert logits.shape == (B, S, N_VOCAB)
    assert jnp.allclose(logits, ref, atol=5e-2, rtol=5e-2), "bf16 path mismatch"

    # ---- Test 2: non-divisible dims exercise padding + K accumulation -------
    B2, S2, D2, N2 = 2, 5, 200, 300     # M=10; none divide the tiles
    k2 = jax.random.PRNGKey(1)
    kx2, kw2, kb2 = jax.random.split(k2, 3)
    x2 = jax.random.normal(kx2, (B2, S2, D2), dtype=jnp.float32)
    b2nd = 1.0 / (D2 ** 0.5)
    w2 = jax.random.uniform(kw2, (N2, D2), jnp.float32, -b2nd, b2nd)
    bz2 = jax.random.uniform(kb2, (N2,), jnp.float32, -b2nd, b2nd)

    w2_p, b2_p = prepare_bert_head_params(
        w2, bz2, tn=128, tk=128, compute_dtype=jnp.float32)
    logits2 = bert_head_forward(
        x2, w2_p, b2_p, n_vocab=N2, tm=8, tn=128, tk=128)
    jax.block_until_ready(logits2)

    ref2 = x2 @ w2.T + bz2
    assert logits2.shape == (B2, S2, N2)
    assert jnp.allclose(logits2, ref2, atol=1e-3, rtol=1e-3), "padded path mismatch"

    print("KERNEL_OK")
</pallas_src>

<mosaic_0001>
module attributes {stable_mosaic.version = 11 : i64} {
  func.func @_linear_kernel(%arg0: i32, %arg1: i32, %arg2: i32, %arg3: memref<16x128xbf16, #tpu.memory_space<vmem>>, %arg4: memref<256x128xbf16, #tpu.memory_space<vmem>>, %arg5: memref<1x256xf32, #tpu.memory_space<vmem>>, %arg6: memref<16x256xf32, #tpu.memory_space<vmem>>, %arg7: memref<16x256xf32, #tpu.memory_space<vmem>>) attributes {dimension_semantics = [#tpu.dimension_semantics<parallel>, #tpu.dimension_semantics<parallel>, #tpu.dimension_semantics<arbitrary>], iteration_bounds = array<i64: 1, 1, 1>, scalar_prefetch = 0 : i64, scratch_operands = 1 : i64, tpu.core_type = #tpu.core_type<tc>, window_params = [{transform_indices = @transform_0, window_bounds = array<i64: 16, 128>}, {transform_indices = @transform_1, window_bounds = array<i64: 256, 128>}, {transform_indices = @transform_2, window_bounds = array<i64: 1, 256>}, {transform_indices = @transform_3, window_bounds = array<i64: 16, 256>}]} {
    %c0_i32 = arith.constant 0 : i32
    %0 = arith.cmpi eq, %arg2, %c0_i32 : i32
    %1 = arith.extui %0 : i1 to i32
    %c0_i32_0 = arith.constant 0 : i32
    %2 = arith.cmpi ne, %1, %c0_i32_0 : i32
    scf.if %2 {
      %c0_10 = arith.constant 0 : index
      %c0_11 = arith.constant 0 : index
      %12 = vector.load %arg5[%c0_10, %c0_11] : memref<1x256xf32, #tpu.memory_space<vmem>>, vector<1x256xf32>
      %13 = vector.shape_cast %12 : vector<1x256xf32> to vector<1x256xf32>
      %14 = vector.broadcast %13 : vector<1x256xf32> to vector<16x256xf32>
      %c0_12 = arith.constant 0 : index
      %c0_13 = arith.constant 0 : index
      %15 = vector.load %arg7[%c0_12, %c0_13] : memref<16x256xf32, #tpu.memory_space<vmem>>, vector<16x256xf32>
      tpu.vector_store %arg7[%c0_12, %c0_13], %14 {strides = array<i32>} : memref<16x256xf32, #tpu.memory_space<vmem>>, vector<16x256xf32>,
    } else {
    }
    %c0 = arith.constant 0 : index
    %c0_1 = arith.constant 0 : index
    %3 = vector.load %arg7[%c0, %c0_1] : memref<16x256xf32, #tpu.memory_space<vmem>>, vector<16x256xf32>
    %c0_2 = arith.constant 0 : index
    %c0_3 = arith.constant 0 : index
    %4 = vector.load %arg3[%c0_2, %c0_3] : memref<16x128xbf16, #tpu.memory_space<vmem>>, vector<16x128xbf16>
    %c0_4 = arith.constant 0 : index
    %c0_5 = arith.constant 0 : index
    %5 = vector.load %arg4[%c0_4, %c0_5] : memref<256x128xbf16, #tpu.memory_space<vmem>>, vector<256x128xbf16>
    %cst = arith.constant dense<0.000000e+00> : vector<16x256xf32>
    %6 = tpu.matmul %4, %5, %cst {dimension_numbers = #tpu.dot_dimension_numbers<[1], [1], [0], [0], [0, 0, 1, 0], [], []>} : vector<16x128xbf16>, vector<256x128xbf16>, vector<16x256xf32> -> vector<16x256xf32>
    %7 = arith.addf %3, %6 : vector<16x256xf32>
    %c0_6 = arith.constant 0 : index
    %c0_7 = arith.constant 0 : index
    %8 = vector.load %arg7[%c0_6, %c0_7] : memref<16x256xf32, #tpu.memory_space<vmem>>, vector<16x256xf32>
    tpu.vector_store %arg7[%c0_6, %c0_7], %7 {strides = array<i32>} : memref<16x256xf32, #tpu.memory_space<vmem>>, vector<16x256xf32>,
    %c0_i32_8 = arith.constant 0 : i32
    %9 = arith.cmpi eq, %arg2, %c0_i32_8 : i32
    %10 = arith.extui %9 : i1 to i32
    %c0_i32_9 = arith.constant 0 : i32
    %11 = arith.cmpi ne, %10, %c0_i32_9 : i32
    scf.if %11 {
      %c0_10 = arith.constant 0 : index
      %c0_11 = arith.constant 0 : index
      %12 = vector.load %arg7[%c0_10, %c0_11] : memref<16x256xf32, #tpu.memory_space<vmem>>, vector<16x256xf32>
      %c0_12 = arith.constant 0 : index
      %c0_13 = arith.constant 0 : index
      %13 = vector.load %arg6[%c0_12, %c0_13] : memref<16x256xf32, #tpu.memory_space<vmem>>, vector<16x256xf32>
      tpu.vector_store %arg6[%c0_12, %c0_13], %12 {strides = array<i32>} : memref<16x256xf32, #tpu.memory_space<vmem>>, vector<16x256xf32>,
    } else {
    }
    return
  }
  func.func @transform_0(%arg0: i32, %arg1: i32, %arg2: i32) -> (i32, i32) {
    %c0_i32 = arith.constant 0 : i32
    return %arg0, %arg2 : i32, i32
  }
  func.func @transform_1(%arg0: i32, %arg1: i32, %arg2: i32) -> (i32, i32) {
    %c0_i32 = arith.constant 0 : i32
    return %arg1, %arg2 : i32, i32
  }
  func.func @transform_2(%arg0: i32, %arg1: i32, %arg2: i32) -> (i32, i32) {
    %c0_i32 = arith.constant 0 : i32
    %c0_i32_0 = arith.constant 0 : i32
    return %c0_i32, %arg1 : i32, i32
  }
  func.func @transform_3(%arg0: i32, %arg1: i32, %arg2: i32) -> (i32, i32) {
    %c0_i32 = arith.constant 0 : i32
    return %arg0, %arg1 : i32, i32
  }
}

</mosaic_0001>

<bundles_post_ra>
// kernel: bert_head_forward.1
= control target key start
LH: loop header
LB: loop body
LE: loop exit
PB: predicated region body
PF: predicated region fallthrough
CT: control target
= control target key end

     0   :  { %8 = vsyncpa [#allocation4], 0  ;;  %s431_s0 = inlined_call_operand.vmem [shape: bf16[16,128], index: 0, kind: input, shape index: {}]   ;;  %s432_s1 = inlined_call_operand.hbm [shape: bf16[256,128], index: 1, kind: input, shape index: {}]   ;;  %s433_s2 = inlined_call_operand.vmem [shape: f32[1,256], index: 2, kind: input, shape index: {}]   ;;  %s434_s3 = inlined_call_operand.hbm [shape: f32[16,256], index: 3, kind: output, shape index: {}]  }
   0x1   :  { %9 = vsyncpa [#allocation5], 0  ;;  %s375_s12 = smov [#allocation3]   ;;  %s327_s16 = scalar_lea.hbm %s432_s1, 2048 }
   0x2   :  { %s17_s13 = sshll.u32 %s375_s12, 4  ;;  %p328_p0 = scmp.ne.s32.totalorder %s432_s1, %s327_s16  ;;  %s18_s13 = int_to_ptr.vmem [resolvable:$true] %s17_s13 }
   0x3   :  { %p331_p1 = scmp.lt.u32.totalorder %s327_s16, %s432_s1 }
   0x5   :  { %p333_p2 = pnand %p331_p1, %p328_p0 }
   0x7   :  { %336 = shalt.err (!%p333_p2)
}
   0x8   :  { %s337_s21 = scalar_lea.vmem %s18_s13, 2048  ;;  %p342_p4 = scmp.lt.s32.totalorder %s18_s13, %s18_s13 }
   0x9   :  { %p338_p3 = scmp.ne.s32.totalorder %s18_s13, %s337_s21  ;;  %p343_p5 = scmp.lt.s32.totalorder %s337_s21, %s337_s21 }
   0xb   :  { %p344_p6 = por %p343_p5, %p342_p4 }
   0xd   :  { %p345_p7 = pnand %p344_p6, %p338_p3 }
   0xf   :  { %348 = shalt.err (!%p345_p7)
}
  0x10   :  { %s376_s22 = smov 64   ;;  %s377_s23 = smov 4  }
  0x11   :  { %23 = dma.hbm_to_vmem [thread:$0]  %s432_s1, 2048, %s18_s13, [#allocation4], %s376_s22, %s376_s22, %s377_s23  }
  0x12   :  { %371 = dma.done.wait [#allocation4], 2048  }
  0x13   :  { %372 = vsyncadd [#allocation4], 4294965248  ;;  %v310_v0 = vld [vmem:[#allocation3 + $0x40] sm:$0xff]   ;;  %v312_v2 = vld [vmem:[#allocation3 + $0x48] sm:$0xff]   ;;  %v36_v17 = vlaneseq  ;;  %s378_s28 = smov [#allocation6]  }
  0x14   :  { %v311_v1 = vld [vmem:[#allocation3] sm:$0xff]   ;;  %286 = vmatprep.subr.bf16.mxu0 %v310_v0  ;;  %v313_v3 = vld [vmem:[#allocation3 + $0x8] sm:$0xff]   ;;  %v314_v4 = vld [vmem:[#allocation3 + $0x50] sm:$0xff]   ;;  %s257_s29 = sshll.u32 %s378_s28, 4  ;;  %s258_s29 = int_to_ptr.vmem [resolvable:$true] %s257_s29 }
  0x15   :  { %287 = vmatpush3.bf16.xpose.msra.mxu0 %v311_v1  ;;  %v315_v5 = vld [vmem:[#allocation3 + $0x10] sm:$0xff]   ;;  %v316_v6 = vld [vmem:[#allocation3 + $0x58] sm:$0xff]   ;;  %v326_v7 = vld [vmem:[%s431_s0] sm:$0xff]   ;;  %v37_v18 = vshrl.u32 %v36_v17, 7  ;;  %s349_s30 = scalar_lea.vmem %s258_s29, 512  ;;  %p354_p9 = scmp.lt.s32.totalorder %s258_s29, %s258_s29 }
  0x16   :  { %288 = vmatprep.subr.bf16.mxu0 %v312_v2  ;;  %302 = vmatprep.mubr.bf16.mxu0 %v326_v7  ;;  %v317_v8 = vld [vmem:[#allocation3 + $0x18] sm:$0xff]   ;;  %v318_v9 = vld [vmem:[#allocation3 + $0x60] sm:$0xff]   ;;  %v320_v11 = vld [vmem:[#allocation3 + $0x68] sm:$0xff]   ;;  %p350_p8 = scmp.ne.s32.totalorder %s258_s29, %s349_s30  ;;  %p355_p10 = scmp.lt.s32.totalorder %s349_s30, %s349_s30 }
  0x17   :  { %v319_v10 = vld [vmem:[#allocation3 + $0x20] sm:$0xff]   ;;  %v321_v12 = vld [vmem:[#allocation3 + $0x28] sm:$0xff]   ;;  %v322_v13 = vld [vmem:[#allocation3 + $0x70] sm:$0xff]   ;;  %v38_v19 = vsub.s32 0, %v37_v18  ;;  %v42_v21 = vsub.s32 1, %v37_v18 }
  0x18   :  { %v323_v14 = vld [vmem:[#allocation3 + $0x30] sm:$0xff]   ;;  %v324_v15 = vld [vmem:[#allocation3 + $0x78] sm:$0xff]   ;;  %v34_v20 = vld [vmem:[%s433_s2] sm:$0x3]  ;;  %p356_p11 = por %p355_p10, %p354_p9 }
  0x19   :  { %v325_v16 = vld [vmem:[#allocation3 + $0x38] sm:$0xff]   ;;  %v39_v22 = vrot.slane %v34_v20, %v38_v19  ;;  %v43_v23 = vrot.slane %v34_v20, %v42_v21 }
  0x1a   :  { %p357_p12 = pnand %p356_p11, %p350_p8 }
  0x1d   :  { %289 = vmatpush3.bf16.xpose.msra.mxu0 %v313_v3 }
  0x1e   :  { %290 = vmatprep.subr.bf16.mxu0 %v314_v4 }
  0x25   :  { %291 = vmatpush3.bf16.xpose.msra.mxu0 %v315_v5 }
  0x26   :  { %292 = vmatprep.subr.bf16.mxu0 %v316_v6 }
  0x2d   :  { %293 = vmatpush3.bf16.xpose.msra.mxu0 %v317_v8 }
  0x2e   :  { %294 = vmatprep.subr.bf16.mxu0 %v318_v9 }
  0x35   :  { %295 = vmatpush3.bf16.xpose.msra.mxu0 %v319_v10 }
  0x36   :  { %296 = vmatprep.subr.bf16.mxu0 %v320_v11 }
  0x3d   :  { %297 = vmatpush3.bf16.xpose.msra.mxu0 %v321_v12 }
  0x3e   :  { %298 = vmatprep.subr.bf16.mxu0 %v322_v13 }
  0x45   :  { %299 = vmatpush3.bf16.xpose.msra.mxu0 %v323_v14 }
  0x46   :  { %300 = vmatprep.subr.bf16.mxu0 %v324_v15 }
  0x4d   :  { %301 = vmatpush3.bf16.xpose.msra.mxu0 %v325_v16 }
  0x54   :  { %303 = vmatmul.mubr.bf16.vlgmr.msra.gmra.mrb[0].mxu0 %v326_v7 }
 0x127   :  { %v224_v24 = vpop.f32.mrb[0].mxu0 }
 0x128   :  { %v233_v25 = vadd.f32 %v224_v24, %v39_v22  ;;  %v226_v26 = vpop.f32.mrb[1].mxu0 }
 0x129   :  { %v234_v27 = vadd.f32 %v226_v26, %v43_v23  ;;  %v228_v28 = vpop.f32.mrb[2].mxu0 }
 0x12a   :  { %248 = vst [vmem:[#allocation6] sm:$0xff] %v233_v25  ;;  %v235_v29 = vadd.f32 %v228_v28, %v39_v22  ;;  %v230_v30 = vpop.f32.mrb[3].mxu0 }
 0x12b   :  { %249 = vst [vmem:[#allocation6 + $0x8] sm:$0xff] %v234_v27  ;;  %v236_v31 = vadd.f32 %v230_v30, %v43_v23 }
 0x12c   :  { %250 = vst [vmem:[#allocation6 + $0x10] sm:$0xff] %v235_v29 }
 0x12d   :  { %251 = vst [vmem:[#allocation6 + $0x18] sm:$0xff] %v236_v31 }
 0x12e   :  { %360 = shalt.err (!%p357_p12)
}
 0x12f   :  { %s361_s5 = scalar_lea.hbm %s434_s3, 512 }
 0x130   :  { %p362_p13 = scmp.ne.s32.totalorder %s434_s3, %s361_s5  ;;  %p365_p0 = scmp.lt.u32.totalorder %s361_s5, %s434_s3 }
 0x132   :  { %p367_p1 = pnand %p365_p0, %p362_p13 }
 0x134   :  { %370 = shalt.err (!%p367_p1)
}
 0x135   :  { %s379_s10 = smov 256   ;;  %s380_s11 = smov 16  }
 0x136   :  { %263 = dma.vmem_to_hbm [thread:$0]  %s258_s29, 512, %s434_s3, [#allocation5], %s379_s10, %s379_s10, %s380_s11  }
 0x137   :  { %373 = dma.done.wait [#allocation5], 512  }
 0x138   :  { %374 = vsyncadd [#allocation5], 4294966784 }
 0x139   :  { %267 = vsyncpa [#allocation4], 1 }
 0x13a   :  { %268 = vsyncpa [#allocation5], 1 }

</bundles_post_ra>
